<compile_context>
chip_gen: v7x
topology: tpu7x:2x2x1
jax: 0.10.0
libtpu: 0.0.40
codegen_flags: <defaults>
</compile_context>

<pallas_src>
import jax
import jax.numpy as jnp
from jax import lax
from jax.experimental import pallas as pl
from jax.experimental.pallas import tpu as pltpu


def convblock_kernel(x_ref, w_ref, b_ref, o_ref):
    """One (batch n, row-block hb, cout-block co) grid step.

    x_ref: (tile_h + 4, W + 4, C)   halo'd input row slab (compute dtype)
    w_ref: (3, 3*C, tile_co)        kh-major conv*BN-scale weights (compute dtype)
    b_ref: (1, tile_co)             folded BatchNorm bias (f32)
    o_ref: (tile_h, W, tile_co)     output tile
    """
    tile_h, W, tco = o_ref.shape
    C = x_ref.shape[-1]
    M = tile_h * W

    acc = None
    # dilation=2: output (r, c) reads padded rows/cols (r + 2*kh, c + 2*kw).
    for kh in range(3):
        # One full-width load per kh (H-offset slicing is pure addressing); the
        # three kw windows are carved from the loaded value so the sublane-
        # misaligned shifts happen once, off the per-tap load path.
        xk = x_ref[2 * kh:2 * kh + tile_h, :, :]                 # (tile_h, W+4, C)
        cols = jnp.concatenate(
            [xk[:, 2 * kw:2 * kw + W, :] for kw in range(3)], axis=-1)
        cols = cols.reshape(M, 3 * C)                            # im2col block, K = 3C
        part = jnp.dot(cols, w_ref[kh], preferred_element_type=jnp.float32)
        acc = part if acc is None else acc + part                # f32 accumulation

    # BN scale already folded into the weights; epilogue = +bias, ReLU, store.
    y = jnp.maximum(acc + b_ref[...], 0.0)
    o_ref[...] = y.reshape(tile_h, W, tco).astype(o_ref.dtype)


def _vmem_limit_bytes():
    """Generation-dependent scoped-VMEM budget with headroom below physical."""
    cap = 64 * 1024 * 1024
    try:
        cap = int(pltpu.get_tpu_info().vmem_capacity_bytes)
    except Exception:
        pass  # fall back to a conservative 48 MiB budget below
    # 128-MiB parts (v5e/v6e) -> 96 MiB; v7x (64 MiB physical) -> 48 MiB.
    return min(96 * 1024 * 1024, (cap * 3) // 4)


def _pick_tile_co(C):
    if C <= 256:
        return C
    for t in (256, 128):
        if C % t == 0:
            return t
    return C  # no clean split; fall back to untiled Cout


def _pick_tile_h(H, W, C, tile_co, itemsize, vmem_budget, m_target=2048):
    """Largest divisor of H whose tile fits the VMEM budget and keeps
    M = tile_h*W near the MXU-friendly target; prefers >=2 row blocks so the
    hb grid axis can be megacore-sharded on v7x (matters for N=1)."""
    def fits(th):
        m = th * W
        slab = 2 * (th + 4) * (W + 4) * C * itemsize   # double-buffered input slab
        outb = 2 * th * W * tile_co * itemsize         # double-buffered output tile
        wgt = 2 * 9 * C * tile_co * itemsize           # pipelined weights
        work = m * (3 * C + 2 * tile_co) * 4           # f32 im2col block + acc/epilogue
        return slab + outb + wgt + work <= vmem_budget

    divs = [d for d in range(1, H + 1) if H % d == 0]
    cand = [d for d in divs if d * W <= m_target and fits(d)] or [divs[0]]
    best = max(cand)
    if best == H:
        smaller = [d for d in cand if d < H and d * W >= min(1024, (best * W) // 2)]
        if smaller:
            best = max(smaller)
    return best


def convblock_forward(x_nchw, weight_oihw, gamma, beta, running_mean,
                      running_var, eps=1e-5, tile_h=None, compute_dtype=None):
    """ConvBlock forward (inference semantics). x_nchw: (N, C, H, W) -> (N, C, H, W).

    compute_dtype: dtype fed to the MXU (activations + weights).  Pass
    jnp.bfloat16 for production speed (f32 accumulation / epilogue protect
    accuracy); defaults to the input dtype.
    """
    N, C, H, W = x_nchw.shape
    out_dtype = x_nchw.dtype
    compute_dtype = jnp.dtype(out_dtype if compute_dtype is None else compute_dtype)

    vmem_limit = _vmem_limit_bytes()
    tile_co = _pick_tile_co(C)
    if tile_h is None:
        tile_h = _pick_tile_h(H, W, C, tile_co, compute_dtype.itemsize,
                              (vmem_limit * 7) // 10)
    assert H % tile_h == 0, "tile_h must divide H"  # TODO(synk): no ragged-H path
    assert C % tile_co == 0
    nb, nco = H // tile_h, C // tile_co
    Wp = W + 4

    # Fold BatchNorm (eval mode, running stats) into the conv weights (exact:
    # the conv is linear) and a per-channel bias, all in f32 BEFORE any cast.
    # TODO(synk): train-mode BatchNorm (batch statistics) is not implemented.
    scale = gamma.astype(jnp.float32) * lax.rsqrt(running_var.astype(jnp.float32) + eps)
    bias = beta.astype(jnp.float32) - running_mean.astype(jnp.float32) * scale
    w_f32 = weight_oihw.astype(jnp.float32) * scale[:, None, None, None]  # (Cout,Cin,3,3)
    # (Cout, Cin, KH, KW) -> kh-major (3, 3*C, Cout); K index = kw*C + cin so one
    # (M, 3C) x (3C, tile_co) MXU matmul per kh replaces three K=C matmuls.
    w_k = jnp.transpose(w_f32, (2, 3, 1, 0)).reshape(3, 3 * C, C).astype(compute_dtype)
    bias2d = bias.reshape(1, C)

    # NCHW -> NHWC (channels on the lane axis), pad spatially by 2, and present
    # the rows as halo'd slabs so per-step VMEM scales with tile_h, not H, and
    # each TensorCore only pulls its own rows (+halo) under megacore sharding.
    # TODO(synk): a zero-copy variant (element-offset BlockSpec indexing or a
    # manual make_async_copy halo pipeline) would avoid this extra HBM pass.
    x_nhwc = jnp.transpose(x_nchw, (0, 2, 3, 1)).astype(compute_dtype)
    x_pad = jnp.pad(x_nhwc, ((0, 0), (2, 2), (2, 2), (0, 0)))
    row_idx = (jnp.arange(nb) * tile_h)[:, None] + jnp.arange(tile_h + 4)[None, :]
    x_slabs = x_pad[:, row_idx]                                 # (N, nb, th+4, Wp, C)

    out_nhwc = pl.pallas_call(
        convblock_kernel,
        out_shape=jax.ShapeDtypeStruct((N, H, W, C), out_dtype),
        grid=(N, nb, nco),
        in_specs=[
            # Halo'd row slab for this (n, hb): constant across the co axis so
            # it is DMA'd once per row block and double-buffered across blocks.
            pl.BlockSpec((None, None, tile_h + 4, Wp, C),
                         lambda n, hb, co: (n, hb, 0, 0, 0)),
            # Folded weights / bias: only the Cout block varies; with nco == 1
            # (C <= 256) they are DMA'd once and stay resident.
            pl.BlockSpec((3, 3 * C, tile_co), lambda n, hb, co: (0, 0, co)),
            pl.BlockSpec((1, tile_co), lambda n, hb, co: (0, co)),
        ],
        out_specs=pl.BlockSpec((None, tile_h, W, tile_co),
                               lambda n, hb, co: (n, hb, 0, co)),
        compiler_params=pltpu.CompilerParams(
            # All axes independent -> megacore sharding on v7x (N and hb both
            # splittable; tile picker keeps nb >= 2 for the N=1 case).
            dimension_semantics=("parallel", "parallel", "parallel"),
            vmem_limit_bytes=vmem_limit,
        ),
    )(x_slabs, w_k, bias2d)

    return jnp.transpose(out_nhwc, (0, 3, 1, 2))  # back to NCHW


def reference_forward(x_nchw, weight_oihw, gamma, beta, running_mean,
                      running_var, eps=1e-5):
    out = lax.conv_general_dilated(
        x_nchw.astype(jnp.float32), weight_oihw.astype(jnp.float32),
        window_strides=(1, 1), padding=((2, 2), (2, 2)), rhs_dilation=(2, 2),
        dimension_numbers=("NCHW", "OIHW", "NCHW"),
        precision=lax.Precision.HIGHEST)
    scale = gamma / jnp.sqrt(running_var + eps)
    bias = beta - running_mean * scale
    out = out * scale[None, :, None, None] + bias[None, :, None, None]
    return jnp.maximum(out, 0.0)


if __name__ == "__main__":
    key = jax.random.PRNGKey(0)
    kx, kw_, kg, kb, km, kv = jax.random.split(key, 6)

    N, C, H, W = 2, 4, 16, 16
    x = jax.random.normal(kx, (N, C, H, W), dtype=jnp.float32)

    # Deterministic Conv2d weight + BatchNorm2d parameters.
    weight = jax.random.normal(kw_, (C, C, 3, 3), dtype=jnp.float32) * 0.1
    gamma = 1.0 + 0.1 * jax.random.normal(kg, (C,), dtype=jnp.float32)
    beta = 0.1 * jax.random.normal(kb, (C,), dtype=jnp.float32)
    running_mean = 0.1 * jax.random.normal(km, (C,), dtype=jnp.float32)
    running_var = jnp.abs(1.0 + 0.1 * jax.random.normal(kv, (C,), dtype=jnp.float32))

    # tile_h=8 -> grid (N, nb, nco) = (2, 2, 1): exercises the halo'd row-slab
    # path (top boundary, interior, bottom boundary) on the small test shape.
    out = convblock_forward(x, weight, gamma, beta, running_mean, running_var,
                            tile_h=8)
    out = jax.block_until_ready(out)

    ref = reference_forward(x, weight, gamma, beta, running_mean, running_var)
    assert out.shape == (N, C, H, W)
    max_err = float(jnp.max(jnp.abs(out - ref)))
    assert jnp.allclose(out, ref, atol=5e-3, rtol=5e-3), (
        f"mismatch vs reference (max abs err {max_err})")

    print("KERNEL_OK")
</pallas_src>

<mosaic_0001>
module attributes {stable_mosaic.version = 11 : i64} {
  func.func @convblock_kernel(%arg0: i32, %arg1: i32, %arg2: i32, %arg3: memref<1x1x12x20x4xf32, #tpu.memory_space<vmem>>, %arg4: memref<3x12x4xf32, #tpu.memory_space<vmem>>, %arg5: memref<1x4xf32, #tpu.memory_space<vmem>>, %arg6: memref<1x8x16x4xf32, #tpu.memory_space<vmem>>) attributes {dimension_semantics = [#tpu.dimension_semantics<parallel>, #tpu.dimension_semantics<parallel>, #tpu.dimension_semantics<parallel>], iteration_bounds = array<i64: 2, 2, 1>, scalar_prefetch = 0 : i64, scratch_operands = 0 : i64, tpu.core_type = #tpu.core_type<tc>, window_params = [{transform_indices = @transform_0, window_bounds = array<i64: 1, 1, 12, 20, 4>}, {transform_indices = @transform_1, window_bounds = array<i64: 3, 12, 4>}, {transform_indices = @transform_2, window_bounds = array<i64: 1, 4>}, {transform_indices = @transform_3, window_bounds = array<i64: 1, 8, 16, 4>}]} {
    %c0 = arith.constant 0 : index
    %c0_0 = arith.constant 0 : index
    %c0_1 = arith.constant 0 : index
    %c0_2 = arith.constant 0 : index
    %c0_3 = arith.constant 0 : index
    %0 = vector.load %arg3[%c0, %c0_0, %c0_1, %c0_2, %c0_3] : memref<1x1x12x20x4xf32, #tpu.memory_space<vmem>>, vector<1x1x8x20x4xf32>
    %1 = vector.shape_cast %0 : vector<1x1x8x20x4xf32> to vector<8x20x4xf32>
    %2 = vector.extract_strided_slice %1 {offsets = [0, 0, 0], sizes = [8, 16, 4], strides = [1, 1, 1]} : vector<8x20x4xf32> to vector<8x16x4xf32>
    %3 = vector.extract_strided_slice %1 {offsets = [0, 2, 0], sizes = [8, 16, 4], strides = [1, 1, 1]} : vector<8x20x4xf32> to vector<8x16x4xf32>
    %4 = vector.extract_strided_slice %1 {offsets = [0, 4, 0], sizes = [8, 16, 4], strides = [1, 1, 1]} : vector<8x20x4xf32> to vector<8x16x4xf32>
    %5 = tpu.concatenate %2, %3, %4 in 2 : vector<8x16x4xf32>, vector<8x16x4xf32>, vector<8x16x4xf32> -> vector<8x16x12xf32>
    %6 = vector.shape_cast %5 : vector<8x16x12xf32> to vector<128x12xf32>
    %c0_4 = arith.constant 0 : index
    %c0_5 = arith.constant 0 : index
    %c0_6 = arith.constant 0 : index
    %7 = vector.load %arg4[%c0_4, %c0_5, %c0_6] : memref<3x12x4xf32, #tpu.memory_space<vmem>>, vector<1x12x4xf32>
    %8 = vector.shape_cast %7 : vector<1x12x4xf32> to vector<12x4xf32>
    %cst = arith.constant dense<0.000000e+00> : vector<128x4xf32>
    %9 = tpu.matmul %6, %8, %cst {dimension_numbers = #tpu.dot_dimension_numbers<[1], [0], [0], [1], [0, 0, 1, 1], [], []>} : vector<128x12xf32>, vector<12x4xf32>, vector<128x4xf32> -> vector<128x4xf32>
    %c0_7 = arith.constant 0 : index
    %c0_8 = arith.constant 0 : index
    %c2 = arith.constant 2 : index
    %c0_9 = arith.constant 0 : index
    %c0_10 = arith.constant 0 : index
    %10 = vector.load %arg3[%c0_7, %c0_8, %c2, %c0_9, %c0_10] : memref<1x1x12x20x4xf32, #tpu.memory_space<vmem>>, vector<1x1x8x20x4xf32>
    %11 = vector.shape_cast %10 : vector<1x1x8x20x4xf32> to vector<8x20x4xf32>
    %12 = vector.extract_strided_slice %11 {offsets = [0, 0, 0], sizes = [8, 16, 4], strides = [1, 1, 1]} : vector<8x20x4xf32> to vector<8x16x4xf32>
    %13 = vector.extract_strided_slice %11 {offsets = [0, 2, 0], sizes = [8, 16, 4], strides = [1, 1, 1]} : vector<8x20x4xf32> to vector<8x16x4xf32>
    %14 = vector.extract_strided_slice %11 {offsets = [0, 4, 0], sizes = [8, 16, 4], strides = [1, 1, 1]} : vector<8x20x4xf32> to vector<8x16x4xf32>
    %15 = tpu.concatenate %12, %13, %14 in 2 : vector<8x16x4xf32>, vector<8x16x4xf32>, vector<8x16x4xf32> -> vector<8x16x12xf32>
    %16 = vector.shape_cast %15 : vector<8x16x12xf32> to vector<128x12xf32>
    %c1 = arith.constant 1 : index
    %c0_11 = arith.constant 0 : index
    %c0_12 = arith.constant 0 : index
    %17 = vector.load %arg4[%c1, %c0_11, %c0_12] : memref<3x12x4xf32, #tpu.memory_space<vmem>>, vector<1x12x4xf32>
    %18 = vector.shape_cast %17 : vector<1x12x4xf32> to vector<12x4xf32>
    %cst_13 = arith.constant dense<0.000000e+00> : vector<128x4xf32>
    %19 = tpu.matmul %16, %18, %cst_13 {dimension_numbers = #tpu.dot_dimension_numbers<[1], [0], [0], [1], [0, 0, 1, 1], [], []>} : vector<128x12xf32>, vector<12x4xf32>, vector<128x4xf32> -> vector<128x4xf32>
    %20 = arith.addf %9, %19 : vector<128x4xf32>
    %c0_14 = arith.constant 0 : index
    %c0_15 = arith.constant 0 : index
    %c4 = arith.constant 4 : index
    %c0_16 = arith.constant 0 : index
    %c0_17 = arith.constant 0 : index
    %21 = vector.load %arg3[%c0_14, %c0_15, %c4, %c0_16, %c0_17] : memref<1x1x12x20x4xf32, #tpu.memory_space<vmem>>, vector<1x1x8x20x4xf32>
    %22 = vector.shape_cast %21 : vector<1x1x8x20x4xf32> to vector<8x20x4xf32>
    %23 = vector.extract_strided_slice %22 {offsets = [0, 0, 0], sizes = [8, 16, 4], strides = [1, 1, 1]} : vector<8x20x4xf32> to vector<8x16x4xf32>
    %24 = vector.extract_strided_slice %22 {offsets = [0, 2, 0], sizes = [8, 16, 4], strides = [1, 1, 1]} : vector<8x20x4xf32> to vector<8x16x4xf32>
    %25 = vector.extract_strided_slice %22 {offsets = [0, 4, 0], sizes = [8, 16, 4], strides = [1, 1, 1]} : vector<8x20x4xf32> to vector<8x16x4xf32>
    %26 = tpu.concatenate %23, %24, %25 in 2 : vector<8x16x4xf32>, vector<8x16x4xf32>, vector<8x16x4xf32> -> vector<8x16x12xf32>
    %27 = vector.shape_cast %26 : vector<8x16x12xf32> to vector<128x12xf32>
    %c2_18 = arith.constant 2 : index
    %c0_19 = arith.constant 0 : index
    %c0_20 = arith.constant 0 : index
    %28 = vector.load %arg4[%c2_18, %c0_19, %c0_20] : memref<3x12x4xf32, #tpu.memory_space<vmem>>, vector<1x12x4xf32>
    %29 = vector.shape_cast %28 : vector<1x12x4xf32> to vector<12x4xf32>
    %cst_21 = arith.constant dense<0.000000e+00> : vector<128x4xf32>
    %30 = tpu.matmul %27, %29, %cst_21 {dimension_numbers = #tpu.dot_dimension_numbers<[1], [0], [0], [1], [0, 0, 1, 1], [], []>} : vector<128x12xf32>, vector<12x4xf32>, vector<128x4xf32> -> vector<128x4xf32>
    %31 = arith.addf %20, %30 : vector<128x4xf32>
    %c0_22 = arith.constant 0 : index
    %c0_23 = arith.constant 0 : index
    %32 = vector.load %arg5[%c0_22, %c0_23] : memref<1x4xf32, #tpu.memory_space<vmem>>, vector<1x4xf32>
    %33 = vector.broadcast %32 : vector<1x4xf32> to vector<128x4xf32>
    %34 = arith.addf %31, %33 : vector<128x4xf32>
    %cst_24 = arith.constant 0.000000e+00 : f32
    %35 = vector.broadcast %cst_24 : f32 to vector<128x4xf32>
    %36 = arith.maximumf %34, %35 : vector<128x4xf32>
    %37 = vector.shape_cast %36 : vector<128x4xf32> to vector<8x16x4xf32>
    %c0_25 = arith.constant 0 : index
    %c0_26 = arith.constant 0 : index
    %c0_27 = arith.constant 0 : index
    %c0_28 = arith.constant 0 : index
    %38 = vector.load %arg6[%c0_25, %c0_26, %c0_27, %c0_28] : memref<1x8x16x4xf32, #tpu.memory_space<vmem>>, vector<1x8x16x4xf32>
    %39 = vector.shape_cast %38 : vector<1x8x16x4xf32> to vector<8x16x4xf32>
    %40 = vector.shape_cast %37 : vector<8x16x4xf32> to vector<1x8x16x4xf32>
    tpu.vector_store %arg6[%c0_25, %c0_26, %c0_27, %c0_28], %40 {strides = array<i32>} : memref<1x8x16x4xf32, #tpu.memory_space<vmem>>, vector<1x8x16x4xf32>,
    return
  }
  func.func @transform_0(%arg0: i32, %arg1: i32, %arg2: i32) -> (i32, i32, i32, i32, i32) {
    %c0_i32 = arith.constant 0 : i32
    %c0_i32_0 = arith.constant 0 : i32
    %c0_i32_1 = arith.constant 0 : i32
    %c0_i32_2 = arith.constant 0 : i32
    return %arg0, %arg1, %c0_i32, %c0_i32_0, %c0_i32_1 : i32, i32, i32, i32, i32
  }
  func.func @transform_1(%arg0: i32, %arg1: i32, %arg2: i32) -> (i32, i32, i32) {
    %c0_i32 = arith.constant 0 : i32
    %c0_i32_0 = arith.constant 0 : i32
    %c0_i32_1 = arith.constant 0 : i32
    return %c0_i32, %c0_i32_0, %arg2 : i32, i32, i32
  }
  func.func @transform_2(%arg0: i32, %arg1: i32, %arg2: i32) -> (i32, i32) {
    %c0_i32 = arith.constant 0 : i32
    %c0_i32_0 = arith.constant 0 : i32
    return %c0_i32, %arg2 : i32, i32
  }
  func.func @transform_3(%arg0: i32, %arg1: i32, %arg2: i32) -> (i32, i32, i32, i32) {
    %c0_i32 = arith.constant 0 : i32
    %c0_i32_0 = arith.constant 0 : i32
    return %arg0, %arg1, %c0_i32, %arg2 : i32, i32, i32, i32
  }
}

</mosaic_0001>

<bundles_post_ra>
// kernel: tpu_custom_call.1
= control target key start
LH: loop header
LB: loop body
LE: loop exit
PB: predicated region body
PF: predicated region fallthrough
CT: control target
= control target key end

     0   :  { %s2253_s12 = smov 0   ;;  %s2255_s13 = smov 0   ;;  %s3203_s0 = inlined_call_operand.vmem [shape: f32[2,2,12,20,4], index: 0, kind: input, shape index: {}]   ;;  %s3204_s1 = inlined_call_operand.vmem [shape: f32[3,12,4], index: 1, kind: input, shape index: {}]   ;;  %s3205_s2 = inlined_call_operand.vmem [shape: f32[1,4], index: 2, kind: input, shape index: {}]   ;;  %s3206_s3 = inlined_call_operand.vmem [shape: f32[2,16,16,4], index: 3, kind: output, shape index: {}]  }
   0x1   :  { %s2257_s14 = smov 0   ;;  %s2259_s15 = smov 0  }
   0x2   :  { %s2261_s16 = smov 0  }
   0x3 LB: > { %s28_s17 = sadd.s32 1, %s2220_s14  ;;  %s32_s18 = sadd.s32 1, %s2224_s15  ;;  %s2228_s16 = sphi %s2261_s16, %s13_s16   ;;  %s2224_s15 = sphi %s2259_s15, %s3262_s15   ;;  %s2220_s14 = sphi %s2257_s14, %s3261_s14   ;;  %s2216_s13 = sphi %s2255_s13, %s3260_s13   ;;  %s2212_s12 = sphi %s2253_s12, %s3259_s12  }
   0x4   : > { %p30_p0 = scmp.ge.s32.totalorder %s28_s17, 2  ;;  %p1843_p1 = scmp.ge.s32.totalorder %s2228_s16, 1 }
   0x5   : > { %p183_p2 = scmp.lt.s32.totalorder %s2228_s16, 5 }
   0x6   : > { %s3264_s17 = smov (%p30_p0, %s28_s17), 0  ;;  %s3266_s18 = smov (!%p30_p0, %s32_s18), %s2224_s15 }
   0x7   : > { %p184_p3 = pnand %p1843_p1, %p183_p2  ;;  %p34_p4 = scmp.ge.s32.totalorder %s3266_s18, 2 }
   0x9   : > { %s3268_s18 = smov (%p34_p4, %s3266_s18), 0  ;;  %187 = sbr.rel (%p184_p3) target bundleno = 554 (0x22a), region = 32 }
  0x10   : > { %p226_p5 = scmp.lt.s32.totalorder %s2216_s13, 1  ;;  %p228_p6 = scmp.lt.s32.totalorder %s2212_s12, 1  ;;  %v1873_v0 = vld [vmem:[%s3204_s1 + $0x10] sm:$0xff]  ;;  %v1874_v1 = vld [vmem:[%s3204_s1 + $0x18] sm:$0xf]  ;;  %v516_v2 = vld [vmem:[%s3204_s1] sm:$0xff] }
  0x11   : > { %vm304_vm0 = vcmask 1045504   ;;  %v2093_v3 = vpack.c.bf16 %v1874_v1, %v1873_v0  ;;  %v517_v4 = vld [vmem:[%s3204_s1 + $0x8] sm:$0xf]  ;;  %vm393_vm1 = vcmask 1043456   ;;  %vm2230_vm2 = vmmov 1   ;;  %s2231_s8 = smov 4  }
  0x12   : > { %s3270_s13 = smov (!%p226_p5, %s2216_s13), 1  ;;  %v2314_v8 = vpack.c.bf16 %v517_v4, %v516_v2  ;;  %vm2326_vm3 = vmpackc.low %vm393_vm1, %vm2230_vm2  ;;  %s2232_s9 = smov 8   ;;  %vm482_vm4 = vcmask 31744   ;;  %vm499_vm5 = vcmask 64512   ;;  %vm778_vm6 = vcmask 97280  }
  0x13   : > { %s229_s19 = scalar_select %p228_p6, %s2212_s12, 1  ;;  %2095 = vmatprep.subr.msk.bf16.mxu1 %vm2326_vm3, %v2093_v3 }
  0x14   : > { %s2146_s20 = smul.u32 72, %s3270_s13  ;;  %2101 = vmatprep.subr.msk.bf16.mxu0 %vm2326_vm3, %v2314_v8  ;;  %2098 = vmatpush3.bf16.msk.msra.mxu1 %vm2326_vm3, %v2093_v3 }
  0x15   : > { %s2145_s21 = smul.u32 36, %s229_s19  ;;  %2104 = vmatpush3.bf16.msk.msra.mxu0 %vm2326_vm3, %v2314_v8  ;;  %2111 = vmatprep.subr.msk.bf16.mxu1 %vm2326_vm3, %v2314_v8 }
  0x17   : > { %s232_s22 = sadd.s32 %s2146_s20, %s2145_s21  ;;  %s1845_s21 = sshll.u32 %s2212_s12, 3 }
  0x18   : > { %s1844_s23 = sshll.u32 %s232_s22, 3  ;;  %p245_p7 = scmp.lt.s32.totalorder %s1845_s21, 15 }
  0x19   : > { %s2302_s5 = scalar_lea.vmem %s3203_s0, %s1844_s23  ;;  %s1847_s23 = sshll.u32 %s3270_s13, 5 }
  0x1a   : > { %v2308_v5 = vld [vmem:[%s2302_s5 + $0x8] sm:$0xff]  ;;  %v258_v6 = vld [vmem:[%s2302_s5 + $0x10] sm:$0xf]  ;;  %v2312_v7 = vld [vmem:[%s2302_s5] sm:$0xff]  ;;  %s3272_s21 = smov (!%p245_p7, %s1845_s21), 15 }
  0x1b   : > { %v306_v9 = vrot.slane %v2308_v5, 2  ;;  %v308_v10 = vrot.slane %v258_v6, 2  ;;  %v305_v11 = vrot.slane %v2312_v7, 2  ;;  %v394_v12 = vrot.slane %v2312_v7, 4  ;;  %v2320_v13 = vld [vmem:[%s2302_s5 + $0x30] sm:$0xff]  ;;  %v2323_v14 = vld [vmem:[%s2302_s5 + $0x38] sm:$0xff] }
  0x1c   : > { %v395_v16 = vrot.slane %v2308_v5, 4  ;;  %v567_v17 = vrot.slane %v2320_v13, 2  ;;  %v2333_v18 = vrot.slane %v2323_v14, 2  ;;  %v1851_v19 = vld [vmem:[%s2302_s5 + $0x40] sm:$0xf]  ;;  %v655_v22 = vrot.slane %v2320_v13, 4 }
  0x1d   : > { %v309_v20 = vsel %vm304_vm0, %v306_v9, %v308_v10  ;;  %v307_v21 = vsel %vm304_vm0, %v305_v11, %v306_v9  ;;  %v2357_v25 = vrot.slane %v2323_v14, 4  ;;  %v570_v26 = vrot.slane %v1851_v19, 2  ;;  %v2372_v31 = vld [vmem:[%s2302_s5 + $0x48] sm:$0xff]  ;;  %v2375_v32 = vld [vmem:[%s2302_s5 + $0x50] sm:$0xff]  ;;  %v2378_v33 = vld [vmem:[%s2302_s5 + $0x18] sm:$0xff]  ;;  %s1846_s22 = sshll.u32 %s3272_s21, 1 }
  0x1e   : > { %347 = vrot.lane.b32.xlu1 %v309_v20, %s2231_s8  ;;  %345 = vrot.lane.b32.xlu0 %v307_v21, %s2231_s8  ;;  %v396_v23 = vsel %vm393_vm1, %v394_v12, %v395_v16  ;;  %v2354_v24 = vsel %vm304_vm0, %v567_v17, %v2333_v18  ;;  %v658_v29 = vrot.slane %v1851_v19, 4  ;;  %v397_v30 = vrot.slane %v258_v6, 4  ;;  %3228 = vst [vmem:[#allocation2_spill] sm:$0xff] %v2375_v32  ;;  %v2381_v34 = vld [vmem:[%s2302_s5 + $0x20] sm:$0xff]  ;;  %v2384_v35 = vld [vmem:[%s2302_s5 + $0x28] sm:$0xf]  ;;  %s252_s24 = sadd.s32 %s1847_s23, %s1846_s22 }
  0x1f   : > { %v2367_v27 = vsel %vm393_vm1, %v655_v22, %v2357_v25  ;;  %v571_v28 = vsel %vm304_vm0, %v2333_v18, %v570_v26  ;;  %v572_v36 = vrot.slane %v2372_v31, 2  ;;  %v2391_v37 = vrot.slane %v2375_v32, 2  ;;  %v2402_v45 = vld [vmem:[%s2302_s5 + $0x58] sm:$0xf]  ;;  %v2405_v46 = vld [vmem:[%s2302_s5 + $0x68] sm:$0xff]  ;;  %v2435_v59 = vld [vmem:[%s2302_s5 + $0x80] sm:$0xff] }
  0x20   : > { %v659_v38 = vsel %vm393_vm1, %v2357_v25, %v658_v29  ;;  %v398_v39 = vsel %vm393_vm1, %v395_v16, %v397_v30  ;;  %v310_v40 = vrot.slane %v2378_v33, 2  ;;  %v311_v41 = vrot.slane %v2381_v34, 2  ;;  %3229 = vst [vmem:[#allocation3_spill] sm:$0xff] %v2405_v46  ;;  %v2408_v47 = vld [vmem:[%s2302_s5 + $0x98] sm:$0xff]  ;;  %v1863_v49 = vld [vmem:[%s2302_s5 + $0xa0] sm:$0xf] }
  0x21   : > { %v399_v42 = vrot.slane %v2378_v33, 4  ;;  %v400_v43 = vrot.slane %v2381_v34, 4  ;;  %v313_v44 = vrot.slane %v2384_v35, 2  ;;  %3230 = vst [vmem:[#allocation4_spill] sm:$0xff] %v2408_v47  ;;  %v2414_v48 = vsel %vm304_vm0, %v572_v36, %v2391_v37  ;;  %v1911_v50 = vld [vmem:[%s2302_s5 + $0x70] sm:$0xf] }
  0x22   : > { %434 = vrot.lane.b32.xlu1 %v396_v23, %s2232_s9  ;;  %607 = vrot.lane.b32.xlu0 %v2354_v24, %s2231_s8  ;;  %v312_v51 = vsel %vm304_vm0, %v310_v40, %v311_v41  ;;  %v660_v52 = vrot.slane %v2372_v31, 4  ;;  %v2421_v53 = vrot.slane %v2375_v32, 4  ;;  %v575_v54 = vrot.slane %v2402_v45, 2  ;;  %3231 = vst [vmem:[#allocation5_spill] sm:$0xff] %v2435_v59  ;;  %v2438_v60 = vld [vmem:[%s2302_s5 + $0xb0] sm:$0xff]  ;;  %v2454_v10 = vld [vmem:[%s2302_s5 + $0x60] sm:$0xff] }
  0x23   : > { %v401_v55 = vsel %vm393_vm1, %v399_v42, %v400_v43  ;;  %v314_v56 = vsel %vm304_vm0, %v311_v41, %v313_v44  ;;  %v2429_v57 = vrot.slane %v2405_v46, 2  ;;  %v2432_v58 = vrot.slane %v2405_v46, 4  ;;  %3232 = vst [vmem:[#allocation6_spill] sm:$0xff] %v2438_v60  ;;  %v1866_v1 = vld [vmem:[%s2302_s5 + $0xb8] sm:$0xf]  ;;  %3233 = vst [vmem:[#allocation7_spill] sm:$0xff] %v2454_v10 }
  0x24   : > { %v2441_v61 = vrot.slane %v2408_v47, 2  ;;  %v590_v62 = vrot.slane %v1863_v49, 2  ;;  %v1223_v63 = vrot.slane %v1911_v50, 2  ;;  %v1311_v0 = vrot.slane %v1911_v50, 4  ;;  %v1914_v9 = vld [vmem:[%s2302_s5 + $0x88] sm:$0xf] }
  0x25   : > { %v663_v2 = vrot.slane %v2402_v45, 4  ;;  %v402_v3 = vrot.slane %v2384_v35, 4  ;;  %v2450_v4 = vrot.slane %v2408_v47, 4  ;;  %v678_v6 = vrot.slane %v1863_v49, 4  ;;  %v2482_v23 = vld [vmem:[%s2302_s5 + $0xc8] sm:$0xff]  ;;  %v2518_v50 = vld [vmem:[%s2302_s5 + $0xe0] sm:$0xff] }
  0x26   : > { %695 = vrot.lane.b32.xlu1 %v2367_v27, %s2232_s9  ;;  %609 = vrot.lane.b32.xlu0 %v571_v28, %s2231_s8  ;;  %v2457_v11 = vrot.slane %v2435_v59, 2  ;;  %v2461_v12 = vsel %vm304_vm0, %v2441_v61, %v590_v62  ;;  %v2465_v16 = vsel %vm304_vm0, %v2429_v57, %v1223_v63  ;;  %v2469_v17 = vsel %vm393_vm1, %v2432_v58, %v1311_v0  ;;  %v1869_v26 = vld [vmem:[%s2302_s5 + $0xd0] sm:$0xf]  ;;  %v1917_v36 = vld [vmem:[%s2302_s5 + $0xa0] sm:$0xf]  ;;  %s1848_s27 = sshll.u32 %s252_s24, 3 }
  0x27   : > { %v2472_v19 = vrot.slane %v2435_v59, 4  ;;  %v2476_v20 = vsel %vm393_vm1, %v2450_v4, %v678_v6  ;;  %v2479_v21 = vrot.slane %v2438_v60, 2  ;;  %v595_v22 = vrot.slane %v1866_v1, 2  ;;  %3234 = vst [vmem:[#allocation8_spill] sm:$0xff] %v2482_v23  ;;  %v2503_v42 = vld [vmem:[%s2302_s5 + $0x40] sm:$0xf]  ;;  %s3139_s29 = scalar_lea.vmem %s3206_s3, %s1848_s27 }
  0x28   : > { %v2486_v28 = vrot.slane %v2438_v60, 4  ;;  %v1228_v29 = vrot.slane %v1914_v9, 2  ;;  %v1316_v30 = vrot.slane %v1914_v9, 4  ;;  %v683_v35 = vrot.slane %v1866_v1, 4  ;;  %3235 = vst [vmem:[#allocation9_spill] sm:$0xff] %v2518_v50 }
  0x29   : > { %v2499_v40 = vsel %vm304_vm0, %v2479_v21, %v595_v22  ;;  %v577_v41 = vrot.slane %v2454_v10, 2  ;;  %v664_v62 = vsel %vm393_vm1, %v2421_v53, %v663_v2  ;;  %v403_v63 = vsel %vm393_vm1, %v400_v43, %v402_v3  ;;  %v1920_v6 = vld [vmem:[%s2302_s5 + $0xb8] sm:$0xf]  ;;  %v270_v9 = vld [vmem:[%s2302_s5 + $0x70] sm:$0xf] }
  0x2a   : > { %697 = vrot.lane.b32.xlu1 %v659_v38, %s2232_s9  ;;  %436 = vrot.lane.b32.xlu0 %v398_v39, %s2232_s9  ;;  %v2493_v38 = vsel %vm393_vm1, %v660_v52, %v2421_v53  ;;  %v576_v39 = vsel %vm304_vm0, %v2391_v37, %v575_v54  ;;  %v2507_v44 = vsel %vm304_vm0, %v2457_v11, %v1228_v29  ;;  %v600_v52 = vrot.slane %v1869_v26, 2  ;;  %v273_v60 = vld [vmem:[%s2302_s5 + $0x88] sm:$0xf] }
  0x2b   : > { %v2511_v45 = vsel %vm393_vm1, %v2472_v19, %v1316_v30  ;;  %v2515_v49 = vsel %vm393_vm1, %v2486_v28, %v683_v35  ;;  %v1233_v54 = vrot.slane %v1917_v36, 2  ;;  %v2530_v0 = vrot.slane %v2482_v23, 4  ;;  %v1926_v46 = vld [vmem:[%s2302_s5 + $0xe8] sm:$0xf] }
  0x2c   : > { %v688_v1 = vrot.slane %v1869_v26, 4  ;;  %v318_v22 = vrot.slane %v2503_v42, 2  ;;  %v1923_v26 = vld [vmem:[%s2302_s5 + $0xd0] sm:$0xf]  ;;  %v2556_v30 = vrot.slane %v2518_v50, 2  ;;  %v2559_v35 = vrot.slane %v2518_v50, 4 }
  0x2d   : > { %v2544_v43 = vsel %vm304_vm0, %v2441_v61, %v1233_v54  ;;  %v1243_v47 = vrot.slane %v1923_v26, 2  ;;  %v1331_v59 = vrot.slane %v1923_v26, 4  ;;  %v1336_v50 = vrot.slane %v1926_v46, 4 }
  0x2e   : > { %611 = vrot.lane.b32.xlu1 %v2414_v48, %s2231_s8  ;;  %349 = vrot.lane.b32.xlu0 %v312_v51, %s2231_s8  ;;  %v2521_v51 = vrot.slane %v2482_v23, 2  ;;  %v2553_v29 = vsel %vm393_vm1, %v2530_v0, %v688_v1  ;;  %v328_v23 = vrot.slane %v270_v9, 2 }
  0x30   : > { %v2540_v2 = vsel %vm304_vm0, %v2521_v51, %v600_v52  ;;  %v1326_v52 = vrot.slane %v1920_v6, 4  ;;  %v2587_v26 = vsel %vm304_vm0, %v2429_v57, %v328_v23  ;;  %v422_v23 = vrot.slane %v273_v60, 4 }
  0x32   : > { %438 = vrot.lane.b32.xlu1 %v401_v55, %s2232_s9  ;;  %351 = vrot.lane.b32.xlu0 %v314_v56, %s2231_s8  ;;  %v1321_v55 = vrot.slane %v1917_v36, 4  ;;  %v1872_v56 = vld [vmem:[%s2302_s5 + $0xe8] sm:$0xf] }
  0x33   : > { %v605_v36 = vrot.slane %v1872_v56, 2  ;;  %v693_v54 = vrot.slane %v1872_v56, 4 }
  0x34   : > { %v2548_v3 = vsel %vm393_vm1, %v2450_v4, %v1321_v55  ;;  %v2564_v55 = vsel %vm304_vm0, %v577_v41, %v2429_v57 }
  0x35   : > { %v2568_v1 = vsel %vm304_vm0, %v2556_v30, %v605_v36  ;;  %v2583_v41 = vsel %vm393_vm1, %v2559_v35, %v693_v54  ;;  %v417_v36 = vrot.slane %v270_v9, 4  ;;  %v1248_v9 = vrot.slane %v1926_v46, 2 }
  0x36   : > { %699 = vrot.lane.b32.xlu1 %v2493_v38, %s2232_s9  ;;  %613 = vrot.lane.b32.xlu0 %v576_v39, %s2231_s8  ;;  %v1238_v39 = vrot.slane %v1920_v6, 2  ;;  %v2579_v6 = vsel %vm393_vm1, %v2486_v28, %v1326_v52  ;;  %v1857_v52 = vld [vmem:[%s2302_s5 + $0x70] sm:$0xf]  ;;  %v2620_v46 = vsel %vm393_vm1, %v2472_v19, %v422_v23 }
  0x37   : > { %v2600_v54 = vsel %vm393_vm1, %v2432_v58, %v417_v36  ;;  %3238 = vst [vmem:[#allocation12_spill] sm:$0xff] %v2620_v46  ;;  %v665_v36 = vrot.slane %v2454_v10, 4  ;;  %v668_v23 = vrot.slane %v1857_v52, 4  ;;  %v407_v46 = vrot.slane %v2503_v42, 4  ;;  %v2645_v10 = vld [vmem:[%s2302_s5 + $0x78] sm:$0xff] }
  0x38   : > { %v2575_v56 = vsel %vm304_vm0, %v2479_v21, %v1238_v39  ;;  %v333_v39 = vrot.slane %v273_v60, 2  ;;  %v319_v60 = vsel %vm304_vm0, %v2333_v18, %v318_v22 }
  0x39   : > { %v2638_v18 = vsel %vm393_vm1, %v665_v36, %v2432_v58  ;;  %v408_v42 = vsel %vm393_vm1, %v2357_v25, %v407_v46  ;;  %v267_v36 = vld [vmem:[%s2302_s5 + $0x58] sm:$0xf] }
  0x3a   : > { %701 = vrot.lane.b32.xlu1 %v664_v62, %s2232_s9  ;;  %440 = vrot.lane.b32.xlu0 %v403_v63, %s2232_s9  ;;  %v2591_v62 = vsel %vm304_vm0, %v2521_v51, %v1243_v47  ;;  %v2595_v63 = vsel %vm393_vm1, %v2530_v0, %v1331_v59  ;;  %v2604_v32 = vsel %vm304_vm0, %v2457_v11, %v333_v39  ;;  %v276_v39 = vld [vmem:[%s2302_s5 + $0xa0] sm:$0xf] }
  0x3b   : > { %3236 = vst [vmem:[#allocation10_spill] sm:$0xff] %v2604_v32  ;;  %v2612_v47 = vsel %vm304_vm0, %v2556_v30, %v1248_v9  ;;  %v2616_v59 = vsel %vm393_vm1, %v2559_v35, %v1336_v50  ;;  %v338_v32 = vrot.slane %v276_v39, 2  ;;  %v2627_v9 = vld [vmem:[%s2302_s5 + $0xf8] sm:$0xff] }
  0x3c   : > { %3237 = vst [vmem:[#allocation11_spill] sm:$0xff] %v2616_v59  ;;  %v1929_v59 = vld [vmem:[%s2302_s5 + $0x100] sm:$0xf] }
  0x3d   : > { %v2634_v50 = vsel %vm304_vm0, %v2441_v61, %v338_v32 }
  0x3e   : > { %615 = vrot.lane.b32.xlu1 %v2564_v55, %s2231_s8  ;;  %353 = vrot.lane.b32.xlu0 %v2354_v24, %s2231_s8  ;;  %v580_v24 = vrot.slane %v1857_v52, 2  ;;  %3239 = vst [vmem:[#allocation13_spill] sm:$0xff] %v2634_v50  ;;  %v582_v52 = vrot.slane %v2645_v10, 2  ;;  %v1341_v50 = vrot.slane %v1929_v59, 4 }
  0x40   : > { %v581_v22 = vsel %vm304_vm0, %v2429_v57, %v580_v24  ;;  %v669_v57 = vsel %vm393_vm1, %v2432_v58, %v668_v23  ;;  %v3223_v24 = vrot.slane %v2627_v9, 4  ;;  %v2676_v46 = vsel %vm304_vm0, %v582_v52, %v2457_v11  ;;  %v1860_v23 = vld [vmem:[%s2302_s5 + $0x88] sm:$0xf]  ;;  %v2688_v52 = vld [vmem:[%s2302_s5 + $0x110] sm:$0xff] }
  0x42   : > { %442 = vrot.lane.b32.xlu1 %v2367_v27, %s2232_s9  ;;  %355 = vrot.lane.b32.xlu0 %v319_v60, %s2231_s8  ;;  %v3224_v27 = vrot.slane %v2627_v9, 2  ;;  %v1253_v60 = vrot.slane %v1929_v59, 2  ;;  %v2668_v58 = vsel %vm393_vm1, %v3223_v24, %v1341_v50  ;;  %v323_v59 = vrot.slane %v267_v36, 2 }
  0x43   : > { %3240 = vst [vmem:[#allocation14_spill] sm:$0xff] %v2668_v58  ;;  %v670_v50 = vrot.slane %v2645_v10, 4  ;;  %v412_v24 = vrot.slane %v267_v36, 4 }
  0x44   : > { %v2654_v32 = vsel %vm304_vm0, %v3224_v27, %v1253_v60  ;;  %v585_v60 = vrot.slane %v1860_v23, 2  ;;  %v1932_v27 = vld [vmem:[%s2302_s5 + $0x118] sm:$0xf] }
  0x45   : > { %v1258_v58 = vrot.slane %v1932_v27, 2  ;;  %v413_v36 = vsel %vm393_vm1, %v2421_v53, %v412_v24 }
  0x46   : > { %703 = vrot.lane.b32.xlu1 %v2638_v18, %s2232_s9  ;;  %617 = vrot.lane.b32.xlu0 %v581_v22, %s2231_s8  ;;  %v427_v22 = vrot.slane %v276_v39, 4  ;;  %v324_v39 = vsel %vm304_vm0, %v2391_v37, %v323_v59  ;;  %v586_v37 = vsel %vm304_vm0, %v2457_v11, %v585_v60  ;;  %v673_v59 = vrot.slane %v1860_v23, 4  ;;  %v1933_v60 = vld [vmem:[%s3204_s1 + $0x20] sm:$0xff] }
  0x48   : > { %v2672_v25 = vsel %vm393_vm1, %v2450_v4, %v427_v22  ;;  %v674_v11 = vsel %vm393_vm1, %v2472_v19, %v673_v59 }
  0x49   : > { %3241 = vst [vmem:[#allocation15_spill] sm:$0xff] %v2672_v25  ;;  %v2705_v25 = vld [vmem:[%s2302_s5 + $0x90] sm:$0xff] }
  0x4a   : > { %705 = vrot.lane.b32.xlu1 %v669_v57, %s2232_s9  ;;  %444 = vrot.lane.b32.xlu0 %v408_v42, %s2232_s9  ;;  %v279_v57 = vld [vmem:[%s2302_s5 + $0xb8] sm:$0xf]  ;;  %v587_v23 = vrot.slane %v2705_v25, 2 }
  0x4b   : > { %v343_v42 = vrot.slane %v279_v57, 2 }
  0x4c   : > { %v2743_v24 = vsel %vm304_vm0, %v587_v23, %v2441_v61  ;;  %v2762_v61 = vld [vmem:[%s2302_s5 + $0xa8] sm:$0xff] }
  0x4d   : > { %v2695_v22 = vsel %vm304_vm0, %v2479_v21, %v343_v42  ;;  %v1934_v42 = vld [vmem:[%s3204_s1 + $0x28] sm:$0xf]  ;;  %v592_v59 = vrot.slane %v2762_v61, 2 }
  0x4e   : > { %619 = vrot.lane.b32.xlu1 %v2676_v46, %s2231_s8  ;;  %357 = vrot.lane.b32.xlu0 %v2414_v48, %s2231_s8  ;;  %v2699_v48 = vsel %vm393_vm1, %v670_v50, %v2472_v19  ;;  %v1344_v50 = vrot.slane %v2688_v52, 4 }
  0x52   : > { %446 = vrot.lane.b32.xlu1 %v2493_v38, %s2232_s9  ;;  %359 = vrot.lane.b32.xlu0 %v324_v39, %s2231_s8  ;;  %v3225_v38 = vrot.slane %v2688_v52, 2 }
  0x54   : > { %v2714_v39 = vsel %vm304_vm0, %v3225_v38, %v1258_v58  ;;  %v1346_v58 = vrot.slane %v1932_v27, 4  ;;  %v2728_v38 = vpack.c.bf16 %v1934_v42, %v1933_v60  ;;  %v675_v27 = vrot.slane %v2705_v25, 4 }
  0x56   : > { %707 = vrot.lane.b32.xlu1 %v2699_v48, %s2232_s9  ;;  %621 = vrot.lane.b32.xlu0 %v586_v37, %s2231_s8  ;;  %v432_v37 = vrot.slane %v279_v57, 4  ;;  %v2735_v53 = vsel %vm393_vm1, %v1344_v50, %v1346_v58  ;;  %v2755_v57 = vsel %vm393_vm1, %v675_v27, %v2450_v4  ;;  %v2775_v4 = vsel %vm304_vm0, %v592_v59, %v2479_v21 }
  0x57   : > { %2107 = vmatprep.subr.msk.bf16.mxu0 %vm2326_vm3, %v2728_v38 }
  0x58   : > { %v2739_v19 = vsel %vm393_vm1, %v2486_v28, %v432_v37 }
  0x5a   : > { %709 = vrot.lane.b32.xlu1 %v674_v11, %s2232_s9  ;;  %448 = vrot.lane.b32.xlu0 %v413_v36, %s2232_s9 }
  0x5e   : > { %1260 = vrot.lane.b32.xlu1 %v2564_v55, %s2231_s8  ;;  %623 = vrot.lane.b32.xlu0 %v2743_v24, %s2231_s8 }
  0x62   : > { %711 = vrot.lane.b32.xlu1 %v2755_v57, %s2232_s9  ;;  %625 = vrot.lane.b32.xlu0 %v2461_v12, %s2231_s8  ;;  %v680_v12 = vrot.slane %v2762_v61, 4 }
  0x66   : > { %1348 = vrot.lane.b32.xlu1 %v2638_v18, %s2232_s9  ;;  %1262 = vrot.lane.b32.xlu0 %v2465_v16, %s2231_s8  ;;  %v2784_v16 = vsel %vm393_vm1, %v680_v12, %v2486_v28 }
  0x6a   : > { %1350 = vrot.lane.b32.xlu1 %v2469_v17, %s2232_s9  ;;  %713 = vrot.lane.b32.xlu0 %v2476_v20, %s2232_s9  ;;  %v2791_v17 = vld [vmem:[%s2302_s5 + $0xc0] sm:$0xff] }
  0x6b   : > { %v597_v20 = vrot.slane %v2791_v17, 2  ;;  %v685_v28 = vrot.slane %v2791_v17, 4 }
  0x6d   : > { %v599_v21 = vsel %vm304_vm0, %v597_v20, %v2521_v51 }
  0x6e   : > { %1264 = vrot.lane.b32.xlu1 %v2676_v46, %s2231_s8  ;;  %627 = vrot.lane.b32.xlu0 %v2775_v4, %s2231_s8 }
  0x72   : > { %715 = vrot.lane.b32.xlu1 %v2784_v16, %s2232_s9  ;;  %629 = vrot.lane.b32.xlu0 %v2499_v40, %s2231_s8  ;;  %v687_v40 = vsel %vm393_vm1, %v685_v28, %v2530_v0 }
  0x76   : > { %1352 = vrot.lane.b32.xlu1 %v2699_v48, %s2232_s9  ;;  %1266 = vrot.lane.b32.xlu0 %v2507_v44, %s2231_s8  ;;  %v2814_v44 = vld [vmem:[%s2302_s5 + $0xd8] sm:$0xff] }
  0x77   : > { %v690_v51 = vrot.slane %v2814_v44, 4 }
  0x79   : > { %v2836_v0 = vsel %vm393_vm1, %v690_v51, %v2559_v35  ;;  %v2913_v51 = vld [vmem:[%s2302_s5 + $0xf0] sm:$0xff] }
  0x7a   : > { %1354 = vrot.lane.b32.xlu1 %v2511_v45, %s2232_s9  ;;  %717 = vrot.lane.b32.xlu0 %v2515_v49, %s2232_s9  ;;  %v602_v45 = vrot.slane %v2814_v44, 2 }
  0x7c   : > { %v2827_v49 = vsel %vm304_vm0, %v602_v45, %v2556_v30 }
  0x7e   : > { %1268 = vrot.lane.b32.xlu1 %v2743_v24, %s2231_s8  ;;  %631 = vrot.lane.b32.xlu0 %v599_v21, %s2231_s8 }
  0x82   : > { %719 = vrot.lane.b32.xlu1 %v687_v40, %s2232_s9  ;;  %633 = vrot.lane.b32.xlu0 %v2540_v2, %s2231_s8 }
  0x86   : > { %1356 = vrot.lane.b32.xlu1 %v2755_v57, %s2232_s9  ;;  %1270 = vrot.lane.b32.xlu0 %v2544_v43, %s2231_s8 }
  0x8a   : > { %1358 = vrot.lane.b32.xlu1 %v2548_v3, %s2232_s9  ;;  %721 = vrot.lane.b32.xlu0 %v2553_v29, %s2232_s9 }
  0x8e   : > { %1272 = vrot.lane.b32.xlu1 %v2775_v4, %s2231_s8  ;;  %635 = vrot.lane.b32.xlu0 %v2827_v49, %s2231_s8 }
  0x90   : > { %v348_v2 = vpop.permute.xlu1 %347  ;;  %v346_v43 = vpop.permute.xlu0 %345 }
  0x91   : > { %v483_v3 = vsel %vm482_vm4, %v2312_v7, %v346_v43 }
  0x92   : > { %723 = vrot.lane.b32.xlu1 %v2836_v0, %s2232_s9  ;;  %637 = vrot.lane.b32.xlu0 %v2568_v1, %s2231_s8 }
  0x94   : > { %v435_v29 = vpop.permute.xlu1 %434  ;;  %v608_v30 = vpop.permute.xlu0 %607 }
  0x95   : > { %v500_v11 = vsel %vm499_vm5, %v483_v3, %v435_v29  ;;  %v743_v35 = vsel %vm482_vm4, %v2320_v13, %v608_v30  ;;  %v3245_v30 = vld [vmem:[#allocation11_spill] sm:$0xff] }
  0x96   : > { %1360 = vrot.lane.b32.xlu1 %v2784_v16, %s2232_s9  ;;  %1274 = vrot.lane.b32.xlu0 %v2575_v56, %s2231_s8  ;;  %v484_v56 = vsel %vm482_vm4, %v2308_v5, %v348_v2  ;;  %v3244_v2 = vld [vmem:[#allocation7_spill] sm:$0xff] }
  0x97   : > { %2041 = vmatprep.mubr.msk.f32.mxu0 %vm778_vm6, %v500_v11  ;;  %v3246_v11 = vld [vmem:[#allocation12_spill] sm:$0xff] }
  0x98   : > { %v696_v1 = vpop.permute.xlu1 %695  ;;  %v610_v36 = vpop.permute.xlu0 %609 }
  0x99   : > { %v759_v7 = vsel %vm499_vm5, %v743_v35, %v696_v1  ;;  %v744_v23 = vsel %vm482_vm4, %v2323_v14, %v610_v36  ;;  %v3248_v1 = vld [vmem:[#allocation3_spill] sm:$0xff] }
  0x9a   : > { %1362 = vrot.lane.b32.xlu1 %v2579_v6, %s2232_s9  ;;  %725 = vrot.lane.b32.xlu0 %v2583_v41, %s2232_s9 }
  0x9b   : > { %2013 = vmatprep.mubr.msk.f32.mxu1 %vm778_vm6, %v759_v7 }
  0x9c   : > { %v698_v60 = vpop.permute.xlu1 %697  ;;  %v437_v42 = vpop.permute.xlu0 %436 }
  0x9d   : > { %v760_v58 = vsel %vm499_vm5, %v744_v23, %v698_v60  ;;  %v501_v37 = vsel %vm499_vm5, %v484_v56, %v437_v42 }
  0x9e   : > { %1276 = vrot.lane.b32.xlu1 %v599_v21, %s2231_s8  ;;  %361 = vrot.lane.b32.xlu0 %v2564_v55, %s2231_s8 }
  0x9f   : > { %2014 = vmatmul.mubr.msk.f32.vlgmr.msra.gmra.mrb[0].mxu1 %vm778_vm6, %v760_v58  ;;  %2042 = vmatmul.mubr.msk.f32.vlgmr.msra.gmra.mrb[0].mxu0 %vm778_vm6, %v501_v37  ;;  %v3249_v37 = vld [vmem:[#allocation13_spill] sm:$0xff] }
  0xa0   : > { %v612_v6 = vpop.permute.xlu1 %611  ;;  %v350_v5 = vpop.permute.xlu0 %349  ;;  %2110 = vmatpush3.bf16.msk.msra.mxu0 %vm2326_vm3, %v2728_v38  ;;  %2112 = vmatpush3.bf16.msk.msra.mxu1 %vm2326_vm3, %v2314_v8 }
  0xa1   : > { %v485_v55 = vsel %vm482_vm4, %v2378_v33, %v350_v5  ;;  %v745_v8 = vsel %vm482_vm4, %v2372_v31, %v612_v6  ;;  %v3250_v6 = vrot.slane %v2627_v9, 4 }
  0xa2   : > { %450 = vrot.lane.b32.xlu1 %v2638_v18, %s2232_s9  ;;  %363 = vrot.lane.b32.xlu0 %v2587_v26, %s2231_s8 }
  0xa4   : > { %v439_v41 = vpop.permute.xlu1 %438  ;;  %v352_v27 = vpop.permute.xlu0 %351 }
  0xa5   : > { %v502_v59 = vsel %vm499_vm5, %v485_v55, %v439_v41  ;;  %v486_v33 = vsel %vm482_vm4, %v2381_v34, %v352_v27  ;;  %v2955_v27 = vld [vmem:[%s2302_s5 + $0x108] sm:$0xff] }
  0xa6   : > { %1364 = vrot.lane.b32.xlu1 %v687_v40, %s2232_s9  ;;  %1278 = vrot.lane.b32.xlu0 %v2591_v62, %s2231_s8  ;;  %v3242_v62 = vld [vmem:[#allocation2_spill] sm:$0xff] }
  0xa7   : > { %2044 = vmatprep.mubr.msk.f32.mxu0 %vm778_vm6, %v502_v59 }
  0xa8   : > { %v700_v15 = vpop.permute.xlu1 %699  ;;  %v614_v18 = vpop.permute.xlu0 %613 }
  0xa9   : > { %v761_v26 = vsel %vm499_vm5, %v745_v8, %v700_v15  ;;  %v746_v38 = vsel %vm482_vm4, %v3242_v62, %v614_v18 }
  0xaa   : > { %1366 = vrot.lane.b32.xlu1 %v2595_v63, %s2232_s9  ;;  %452 = vrot.lane.b32.xlu0 %v2600_v54, %s2232_s9  ;;  %v3243_v54 = vld [vmem:[#allocation10_spill] sm:$0xff] }
  0xab   : > { %2016 = vmatprep.mubr.msk.f32.mxu1 %vm778_vm6, %v761_v26  ;;  %v3251_v26 = vld [vmem:[#allocation14_spill] sm:$0xff] }
  0xac   : > { %v702_v12 = vpop.permute.xlu1 %701  ;;  %v441_v20 = vpop.permute.xlu0 %440 }
  0xad   : > { %v762_v21 = vsel %vm499_vm5, %v746_v38, %v702_v12  ;;  %v503_v28 = vsel %vm499_vm5, %v486_v33, %v441_v20  ;;  %v3252_v33 = vld [vmem:[#allocation15_spill] sm:$0xff]  ;;  %v3254_v20 = vld [vmem:[#allocation5_spill] sm:$0xff] }
  0xae   : > { %1280 = vrot.lane.b32.xlu1 %v2827_v49, %s2231_s8  ;;  %365 = vrot.lane.b32.xlu0 %v2676_v46, %s2231_s8 }
  0xaf   : > { %2017 = vmatmul.mubr.msk.f32.gmra.mrb[2].mxu1 %vm778_vm6, %v762_v21  ;;  %2045 = vmatmul.mubr.msk.f32.gmra.mrb[2].mxu0 %vm778_vm6, %v503_v28 }
  0xb0   : > { %v616_v34 = vpop.permute.xlu1 %615  ;;  %v354_v63 = vpop.permute.xlu0 %353 }
  0xb1   : > { %v487_v40 = vsel %vm482_vm4, %v2320_v13, %v354_v63  ;;  %v747_v43 = vsel %vm482_vm4, %v3244_v2, %v616_v34 }
  0xb2   : > { %454 = vrot.lane.b32.xlu1 %v2699_v48, %s2232_s9  ;;  %367 = vrot.lane.b32.xlu0 %v3243_v54, %s2231_s8  ;;  %v1250_v48 = vrot.slane %v2913_v51, 2 }
  0xb4   : > { %v443_v45 = vpop.permute.xlu1 %442  ;;  %v356_v49 = vpop.permute.xlu0 %355 }
  0xb5   : > { %v504_v46 = vsel %vm499_vm5, %v487_v40, %v443_v45  ;;  %v488_v35 = vsel %vm482_vm4, %v2323_v14, %v356_v49  ;;  %v1338_v14 = vrot.slane %v2913_v51, 4 }
  0xb6   : > { %1368 = vrot.lane.b32.xlu1 %v2836_v0, %s2232_s9  ;;  %1282 = vrot.lane.b32.xlu0 %v2612_v47, %s2231_s8  ;;  %v3247_v47 = vrot.slane %v2627_v9, 2 }
  0xb7   : > { %2047 = vmatprep.mubr.msk.f32.mxu0 %vm778_vm6, %v504_v46  ;;  %v1340_v5 = vsel %vm393_vm1, %v1338_v14, %v3250_v6 }
  0xb8   : > { %v704_v13 = vpop.permute.xlu1 %703  ;;  %v618_v3 = vpop.permute.xlu0 %617  ;;  %v1252_v0 = vsel %vm304_vm0, %v1250_v48, %v3247_v47 }
  0xb9   : > { %v763_v29 = vsel %vm499_vm5, %v747_v43, %v704_v13  ;;  %v748_v36 = vsel %vm482_vm4, %v3248_v1, %v618_v3  ;;  %v3255_v3 = vld [vmem:[#allocation4_spill] sm:$0xff] }
  0xba   : > { %1370 = vrot.lane.b32.xlu1 %v3245_v30, %s2232_s9  ;;  %456 = vrot.lane.b32.xlu0 %v3246_v11, %s2232_s9 }
  0xbb   : > { %2019 = vmatprep.mubr.msk.f32.mxu1 %vm778_vm6, %v763_v29 }
  0xbc   : > { %v706_v7 = vpop.permute.xlu1 %705  ;;  %v445_v56 = vpop.permute.xlu0 %444 }
  0xbd   : > { %v764_v23 = vsel %vm499_vm5, %v748_v36, %v706_v7  ;;  %v505_v60 = vsel %vm499_vm5, %v488_v35, %v445_v56 }
  0xbe   : > { %1284 = vrot.lane.b32.xlu1 %v1252_v0, %s2231_s8  ;;  %369 = vrot.lane.b32.xlu0 %v2743_v24, %s2231_s8 }
  0xbf   : > { %2020 = vmatmul.mubr.msk.f32.gmra.mrb[4].mxu1 %vm778_vm6, %v764_v23  ;;  %2048 = vmatmul.mubr.msk.f32.gmra.mrb[4].mxu0 %vm778_vm6, %v505_v60 }
  0xc0   : > { %v620_v42 = vpop.permute.xlu1 %619  ;;  %v358_v58 = vpop.permute.xlu0 %357 }
  0xc1   : > { %v489_v24 = vsel %vm482_vm4, %v2372_v31, %v358_v58  ;;  %v749_v8 = vsel %vm482_vm4, %v2645_v10, %v620_v42  ;;  %v3256_v58 = vld [vmem:[#allocation6_spill] sm:$0xff] }
  0xc2   : > { %458 = vrot.lane.b32.xlu1 %v2755_v57, %s2232_s9  ;;  %371 = vrot.lane.b32.xlu0 %v3249_v37, %s2231_s8  ;;  %v1255_v57 = vrot.slane %v2955_v27, 2 }
  0xc4   : > { %v447_v55 = vpop.permute.xlu1 %446  ;;  %v360_v41 = vpop.permute.xlu0 %359 }
  0xc5   : > { %v506_v59 = vsel %vm499_vm5, %v489_v24, %v447_v55  ;;  %v490_v12 = vsel %vm482_vm4, %v3242_v62, %v360_v41  ;;  %v1343_v62 = vrot.slane %v2955_v27, 4 }
  0xc6   : > { %1372 = vrot.lane.b32.xlu1 %v1340_v5, %s2232_s9  ;;  %1286 = vrot.lane.b32.xlu0 %v2654_v32, %s2231_s8  ;;  %v3253_v32 = vrot.slane %v2688_v52, 2 }
  0xc7   : > { %2050 = vmatprep.mubr.msk.f32.mxu0 %vm778_vm6, %v506_v59  ;;  %v1345_v49 = vsel %vm393_vm1, %v1343_v62, %v1344_v50 }
  0xc8   : > { %v708_v15 = vpop.permute.xlu1 %707  ;;  %v622_v31 = vpop.permute.xlu0 %621  ;;  %v1257_v38 = vsel %vm304_vm0, %v1255_v57, %v3253_v32 }
  0xc9   : > { %v765_v18 = vsel %vm499_vm5, %v749_v8, %v708_v15  ;;  %v750_v21 = vsel %vm482_vm4, %v3254_v20, %v622_v31 }
  0xca   : > { %1374 = vrot.lane.b32.xlu1 %v3251_v26, %s2232_s9  ;;  %460 = vrot.lane.b32.xlu0 %v3252_v33, %s2232_s9 }
  0xcb   : > { %2022 = vmatprep.mubr.msk.f32.mxu1 %vm778_vm6, %v765_v18 }
  0xcc   : > { %v710_v28 = vpop.permute.xlu1 %709  ;;  %v449_v34 = vpop.permute.xlu0 %448 }
  0xcd   : > { %v766_v63 = vsel %vm499_vm5, %v750_v21, %v710_v28  ;;  %v507_v54 = vsel %vm499_vm5, %v490_v12, %v449_v34  ;;  %v3257_v12 = vld [vmem:[#allocation8_spill] sm:$0xff] }
  0xce   : > { %1288 = vrot.lane.b32.xlu1 %v1257_v38, %s2231_s8  ;;  %373 = vrot.lane.b32.xlu0 %v2775_v4, %s2231_s8 }
  0xcf   : > { %2023 = vmatmul.mubr.msk.f32.gmra.mrb[6].mxu1 %vm778_vm6, %v766_v63  ;;  %2051 = vmatmul.mubr.msk.f32.gmra.mrb[6].mxu0 %vm778_vm6, %v507_v54 }
  0xd0   : > { %v1261_v40 = vpop.permute.xlu1 %1260  ;;  %v624_v45 = vpop.permute.xlu0 %623 }
  0xd1   : > { %v751_v4 = vsel %vm482_vm4, %v2705_v25, %v624_v45 }
  0xd2   : > { %462 = vrot.lane.b32.xlu1 %v2784_v16, %s2232_s9  ;;  %375 = vrot.lane.b32.xlu0 %v2695_v22, %s2231_s8  ;;  %v1396_v22 = vsel %vm482_vm4, %v3244_v2, %v1261_v40 }
  0xd4   : > { %v712_v46 = vpop.permute.xlu1 %711  ;;  %v626_v48 = vpop.permute.xlu0 %625 }
  0xd5   : > { %v767_v43 = vsel %vm499_vm5, %v751_v4, %v712_v46 }
  0xd6   : > { %1376 = vrot.lane.b32.xlu1 %v1345_v49, %s2232_s9  ;;  %1290 = vrot.lane.b32.xlu0 %v2714_v39, %s2231_s8  ;;  %v752_v39 = vsel %vm482_vm4, %v3255_v3, %v626_v48 }
  0xd7   : > { %2025 = vmatprep.mubr.msk.f32.mxu1 %vm778_vm6, %v767_v43 }
  0xd8   : > { %v1349_v16 = vpop.permute.xlu1 %1348  ;;  %v1263_v13 = vpop.permute.xlu0 %1262 }
  0xd9   : > { %v1412_v50 = vsel %vm499_vm5, %v1396_v22, %v1349_v16  ;;  %v1397_v29 = vsel %vm482_vm4, %v3248_v1, %v1263_v13 }
  0xda   : > { %1378 = vrot.lane.b32.xlu1 %v2735_v53, %s2232_s9  ;;  %464 = vrot.lane.b32.xlu0 %v2739_v19, %s2232_s9 }
  0xdb   : > { %2069 = vmatprep.mubr.msk.f32.mxu0 %vm778_vm6, %v1412_v50  ;;  %v3258_v50 = vld [vmem:[#allocation9_spill] sm:$0xff] }
  0xdc   : > { %v1351_v30 = vpop.permute.xlu1 %1350  ;;  %v714_v11 = vpop.permute.xlu0 %713 }
  0xdd   : > { %v1413_v47 = vsel %vm499_vm5, %v1397_v29, %v1351_v30  ;;  %v768_v0 = vsel %vm499_vm5, %v752_v39, %v714_v11 }
  0xde   : > { %2026 = vmatmul.mubr.msk.f32.gmra.mrb[8].mxu1 %vm778_vm6, %v768_v0  ;;  %2070 = vmatmul.mubr.msk.f32.vlgmr.msra.gmra.mrb[0].mxu0 %vm778_vm6, %v1413_v47 }
  0xe0   : > { %v1265_v53 = vpop.permute.xlu1 %1264  ;;  %v628_v19 = vpop.permute.xlu0 %627 }
  0xe1   : > { %v753_v35 = vsel %vm482_vm4, %v2762_v61, %v628_v19  ;;  %v1398_v23 = vsel %vm482_vm4, %v2645_v10, %v1265_v53 }
  0xe4   : > { %v716_v36 = vpop.permute.xlu1 %715  ;;  %v630_v7 = vpop.permute.xlu0 %629 }
  0xe5   : > { %v769_v56 = vsel %vm499_vm5, %v753_v35, %v716_v36  ;;  %v754_v37 = vsel %vm482_vm4, %v3256_v58, %v630_v7 }
  0xe6   : > { %2028 = vmatprep.mubr.msk.f32.mxu1 %vm778_vm6, %v769_v56 }
  0xe8   : > { %v1353_v60 = vpop.permute.xlu1 %1352  ;;  %v1267_v14 = vpop.permute.xlu0 %1266 }
  0xe9   : > { %v1414_v42 = vsel %vm499_vm5, %v1398_v23, %v1353_v60  ;;  %v1399_v6 = vsel %vm482_vm4, %v3254_v20, %v1267_v14 }
  0xea   : > { %2072 = vmatprep.mubr.msk.f32.mxu0 %vm778_vm6, %v1414_v42 }
  0xec   : > { %v1355_v5 = vpop.permute.xlu1 %1354  ;;  %v718_v24 = vpop.permute.xlu0 %717 }
  0xed   : > { %v1415_v55 = vsel %vm499_vm5, %v1399_v6, %v1355_v5  ;;  %v770_v41 = vsel %vm499_vm5, %v754_v37, %v718_v24 }
  0xee   : > { %2029 = vmatmul.mubr.msk.f32.gmra.mrb[10].mxu1 %vm778_vm6, %v770_v41  ;;  %2073 = vmatmul.mubr.msk.f32.gmra.mrb[2].mxu0 %vm778_vm6, %v1415_v55 }
  0xf0   : > { %v1269_v59 = vpop.permute.xlu1 %1268  ;;  %v632_v57 = vpop.permute.xlu0 %631 }
  0xf1   : > { %v755_v8 = vsel %vm482_vm4, %v2791_v17, %v632_v57  ;;  %v1400_v26 = vsel %vm482_vm4, %v2705_v25, %v1269_v59 }
  0xf4   : > { %v720_v15 = vpop.permute.xlu1 %719  ;;  %v634_v31 = vpop.permute.xlu0 %633 }
  0xf5   : > { %v771_v18 = vsel %vm499_vm5, %v755_v8, %v720_v15  ;;  %v756_v21 = vsel %vm482_vm4, %v3257_v12, %v634_v31 }
  0xf6   : > { %2031 = vmatprep.mubr.msk.f32.mxu1 %vm778_vm6, %v771_v18 }
  0xf8   : > { %v1357_v33 = vpop.permute.xlu1 %1356  ;;  %v1271_v32 = vpop.permute.xlu0 %1270 }
  0xf9   : > { %v1416_v38 = vsel %vm499_vm5, %v1400_v26, %v1357_v33  ;;  %v1401_v28 = vsel %vm482_vm4, %v3255_v3, %v1271_v32 }
  0xfa   : > { %2075 = vmatprep.mubr.msk.f32.mxu0 %vm778_vm6, %v1416_v38 }
  0xfc   : > { %v1359_v34 = vpop.permute.xlu1 %1358  ;;  %v722_v63 = vpop.permute.xlu0 %721 }
  0xfd   : > { %v1417_v54 = vsel %vm499_vm5, %v1401_v28, %v1359_v34  ;;  %v772_v62 = vsel %vm499_vm5, %v756_v21, %v722_v63 }
  0xfe   : > { %2032 = vmatmul.mubr.msk.f32.gmra.mrb[12].mxu1 %vm778_vm6, %v772_v62  ;;  %2076 = vmatmul.mubr.msk.f32.gmra.mrb[4].mxu0 %vm778_vm6, %v1417_v54 }
 0x100   : > { %v1273_v40 = vpop.permute.xlu1 %1272  ;;  %v636_v45 = vpop.permute.xlu0 %635 }
 0x101   : > { %v757_v49 = vsel %vm482_vm4, %v2814_v44, %v636_v45  ;;  %v1402_v43 = vsel %vm482_vm4, %v2762_v61, %v1273_v40 }
 0x104   : > { %v724_v4 = vpop.permute.xlu1 %723  ;;  %v638_v46 = vpop.permute.xlu0 %637 }
 0x105   : > { %v773_v48 = vsel %vm499_vm5, %v757_v49, %v724_v4  ;;  %v758_v39 = vsel %vm482_vm4, %v3258_v50, %v638_v46 }
 0x106   : > { %2034 = vmatprep.mubr.msk.f32.mxu1 %vm778_vm6, %v773_v48 }
 0x108   : > { %v1361_v22 = vpop.permute.xlu1 %1360  ;;  %v1275_v16 = vpop.permute.xlu0 %1274 }
 0x109   : > { %v1418_v13 = vsel %vm499_vm5, %v1402_v43, %v1361_v22  ;;  %v1403_v29 = vsel %vm482_vm4, %v3256_v58, %v1275_v16 }
 0x10a   : > { %2078 = vmatprep.mubr.msk.f32.mxu0 %vm778_vm6, %v1418_v13 }
 0x10c   : > { %v1363_v30 = vpop.permute.xlu1 %1362  ;;  %v726_v11 = vpop.permute.xlu0 %725 }
 0x10d   : > { %v1419_v47 = vsel %vm499_vm5, %v1403_v29, %v1363_v30  ;;  %v774_v0 = vsel %vm499_vm5, %v758_v39, %v726_v11 }
 0x10e   : > { %2035 = vmatmul.mubr.msk.f32.gmra.mrb[14].mxu1 %vm778_vm6, %v774_v0  ;;  %2079 = vmatmul.mubr.msk.f32.gmra.mrb[6].mxu0 %vm778_vm6, %v1419_v47 }
 0x110   : > { %v1277_v53 = vpop.permute.xlu1 %1276  ;;  %v362_v19 = vpop.permute.xlu0 %361 }
 0x111   : > { %v491_v35 = vsel %vm482_vm4, %v3244_v2, %v362_v19  ;;  %v1404_v23 = vsel %vm482_vm4, %v2791_v17, %v1277_v53 }
 0x114   : > { %v451_v36 = vpop.permute.xlu1 %450  ;;  %v364_v7 = vpop.permute.xlu0 %363 }
 0x115   : > { %v508_v56 = vsel %vm499_vm5, %v491_v35, %v451_v36  ;;  %v492_v37 = vsel %vm482_vm4, %v3248_v1, %v364_v7 }
 0x116   : > { %2053 = vmatprep.mubr.msk.f32.mxu1 %vm778_vm6, %v508_v56 }
 0x118   : > { %v1365_v60 = vpop.permute.xlu1 %1364  ;;  %v1279_v14 = vpop.permute.xlu0 %1278 }
 0x119   : > { %v1420_v42 = vsel %vm499_vm5, %v1404_v23, %v1365_v60  ;;  %v1405_v2 = vsel %vm482_vm4, %v3257_v12, %v1279_v14 }
 0x11a   : > { %2081 = vmatprep.mubr.msk.f32.mxu0 %vm778_vm6, %v1420_v42  ;;  %v3133_v42 = vld [vmem:[%s3205_s2] ss:$0 sm:$0xff] }
 0x11c   : > { %v1367_v6 = vpop.permute.xlu1 %1366  ;;  %v453_v5 = vpop.permute.xlu0 %452 }
 0x11d   : > { %v1421_v24 = vsel %vm499_vm5, %v1405_v2, %v1367_v6  ;;  %v509_v55 = vsel %vm499_vm5, %v492_v37, %v453_v5 }
 0x11e   : > { %2054 = vmatmul.mubr.msk.f32.vlgmr.msra.gmra.mrb[8].mxu1 %vm778_vm6, %v509_v55  ;;  %2082 = vmatmul.mubr.msk.f32.gmra.mrb[8].mxu0 %vm778_vm6, %v1421_v24 }
 0x120   : > { %v1281_v17 = vpop.permute.xlu1 %1280  ;;  %v366_v41 = vpop.permute.xlu0 %365 }
 0x121   : > { %v493_v59 = vsel %vm482_vm4, %v2645_v10, %v366_v41  ;;  %v1406_v15 = vsel %vm482_vm4, %v2814_v44, %v1281_v17 }
 0x124   : > { %v455_v57 = vpop.permute.xlu1 %454  ;;  %v368_v1 = vpop.permute.xlu0 %367 }
 0x125   : > { %v510_v8 = vsel %vm499_vm5, %v493_v59, %v455_v57  ;;  %v494_v33 = vsel %vm482_vm4, %v3254_v20, %v368_v1 }
 0x126   : > { %2056 = vmatprep.mubr.msk.f32.mxu1 %vm778_vm6, %v510_v8 }
 0x128   : > { %v1369_v31 = vpop.permute.xlu1 %1368  ;;  %v1283_v18 = vpop.permute.xlu0 %1282 }
 0x129   : > { %v1422_v26 = vsel %vm499_vm5, %v1406_v15, %v1369_v31  ;;  %v1407_v10 = vsel %vm482_vm4, %v3258_v50, %v1283_v18 }
 0x12a   : > { %2084 = vmatprep.mubr.msk.f32.mxu0 %vm778_vm6, %v1422_v26 }
 0x12c   : > { %v1371_v32 = vpop.permute.xlu1 %1370  ;;  %v457_v38 = vpop.permute.xlu0 %456 }
 0x12d   : > { %v1423_v12 = vsel %vm499_vm5, %v1407_v10, %v1371_v32  ;;  %v511_v21 = vsel %vm499_vm5, %v494_v33, %v457_v38 }
 0x12e   : > { %2057 = vmatmul.mubr.msk.f32.gmra.mrb[10].mxu1 %vm778_vm6, %v511_v21  ;;  %2085 = vmatmul.mubr.msk.f32.gmra.mrb[10].mxu0 %vm778_vm6, %v1423_v12 }
 0x130   : > { %v1285_v44 = vpop.permute.xlu1 %1284  ;;  %v370_v28 = vpop.permute.xlu0 %369 }
 0x131   : > { %v495_v34 = vsel %vm482_vm4, %v2705_v25, %v370_v28  ;;  %v1408_v62 = vsel %vm482_vm4, %v2913_v51, %v1285_v44 }
 0x134   : > { %v459_v63 = vpop.permute.xlu1 %458  ;;  %v372_v20 = vpop.permute.xlu0 %371 }
 0x135   : > { %v512_v54 = vsel %vm499_vm5, %v495_v34, %v459_v63  ;;  %v496_v4 = vsel %vm482_vm4, %v3255_v3, %v372_v20 }
 0x136   : > { %2059 = vmatprep.mubr.msk.f32.mxu1 %vm778_vm6, %v512_v54 }
 0x138   : > { %v1373_v40 = vpop.permute.xlu1 %1372  ;;  %v1287_v45 = vpop.permute.xlu0 %1286 }
 0x139   : > { %v1424_v49 = vsel %vm499_vm5, %v1408_v62, %v1373_v40  ;;  %v1409_v25 = vsel %vm482_vm4, %v2627_v9, %v1287_v45 }
 0x13a   : > { %2087 = vmatprep.mubr.msk.f32.mxu0 %vm778_vm6, %v1424_v49 }
 0x13c   : > { %v1375_v46 = vpop.permute.xlu1 %1374  ;;  %v461_v48 = vpop.permute.xlu0 %460 }
 0x13d   : > { %v1425_v43 = vsel %vm499_vm5, %v1409_v25, %v1375_v46  ;;  %v513_v22 = vsel %vm499_vm5, %v496_v4, %v461_v48 }
 0x13e   : > { %2060 = vmatmul.mubr.msk.f32.gmra.mrb[12].mxu1 %vm778_vm6, %v513_v22  ;;  %2088 = vmatmul.mubr.msk.f32.gmra.mrb[12].mxu0 %vm778_vm6, %v1425_v43 }
 0x140   : > { %v1289_v51 = vpop.permute.xlu1 %1288  ;;  %v374_v16 = vpop.permute.xlu0 %373 }
 0x141   : > { %v497_v13 = vsel %vm482_vm4, %v2762_v61, %v374_v16  ;;  %v1410_v9 = vsel %vm482_vm4, %v2955_v27, %v1289_v51 }
 0x144   : > { %v463_v50 = vpop.permute.xlu1 %462  ;;  %v376_v3 = vpop.permute.xlu0 %375 }
 0x145   : > { %v514_v39 = vsel %vm499_vm5, %v497_v13, %v463_v50  ;;  %v498_v47 = vsel %vm482_vm4, %v3256_v58, %v376_v3 }
 0x146   : > { %2062 = vmatprep.mubr.msk.f32.mxu1 %vm778_vm6, %v514_v39 }
 0x148   : > { %v1377_v29 = vpop.permute.xlu1 %1376  ;;  %v1291_v30 = vpop.permute.xlu0 %1290 }
 0x149   : > { %v1426_v11 = vsel %vm499_vm5, %v1410_v9, %v1377_v29  ;;  %v1411_v61 = vsel %vm482_vm4, %v2688_v52, %v1291_v30 }
 0x14a   : > { %2090 = vmatprep.mubr.msk.f32.mxu0 %vm778_vm6, %v1426_v11 }
 0x14c   : > { %v1379_v0 = vpop.permute.xlu1 %1378  ;;  %v465_v53 = vpop.permute.xlu0 %464 }
 0x14d   : > { %v1427_v19 = vsel %vm499_vm5, %v1411_v61, %v1379_v0  ;;  %v515_v27 = vsel %vm499_vm5, %v498_v47, %v465_v53 }
 0x14e   : > { %2063 = vmatmul.mubr.msk.f32.gmra.mrb[14].mxu1 %vm778_vm6, %v515_v27  ;;  %2091 = vmatmul.mubr.msk.f32.gmra.mrb[14].mxu0 %vm778_vm6, %v1427_v19 }
 0x172   : > { %v2015_v35 = vpop.f32.mrb[0].mxu1 }
 0x173   : > { %v896_v36 = vpop.f32.mrb[1].mxu1 }
 0x182   : > { %v2018_v7 = vpop.f32.mrb[2].mxu1 }
 0x183   : > { %v906_v56 = vpop.f32.mrb[3].mxu1 }
 0x192   : > { %v2021_v23 = vpop.f32.mrb[4].mxu1 }
 0x193   : > { %v916_v58 = vpop.f32.mrb[5].mxu1 }
 0x1a2   : > { %v2024_v60 = vpop.f32.mrb[6].mxu1 }
 0x1a3   : > { %v926_v52 = vpop.f32.mrb[7].mxu1 }
 0x1b1   : > { %v2071_v14 = vpop.f32.mrb[0].mxu0 }
 0x1b2   : > { %v2113_v37 = vadd.f32 %v2071_v14, %v2015_v35  ;;  %v1548_v2 = vpop.f32.mrb[1].mxu0 }
 0x1b3   : > { %v2114_v6 = vadd.f32 %v1548_v2, %v896_v36 }
 0x1b4   : > { %v1651_v5 = vadd.f32 %v2113_v37, %v3133_v42 }
 0x1b5   : > { %v1650_v24 = vadd.f32 %v2114_v6, %v3133_v42 }
 0x1b6   : > { %v1667_v55 = vmax.f32 %v1651_v5, 0.0 }
 0x1b7   : > { %v1666_v17 = vmax.f32 %v1650_v24, 0.0 }
 0x1b8   : > { %1683 = vst.msk [vmem:[%s3139_s29 + $0x8] sm:$0xff] %vm482_vm4, %v1667_v55 }
 0x1b9   : > { %1682 = vst.msk [vmem:[%s3139_s29] sm:$0xff] %vm482_vm4, %v1666_v17 }
 0x1c1   : > { %v2074_v41 = vpop.f32.mrb[2].mxu0 }
 0x1c2   : > { %v2115_v59 = vadd.f32 %v2074_v41, %v2018_v7  ;;  %v1558_v57 = vpop.f32.mrb[3].mxu0 }
 0x1c3   : > { %v2116_v1 = vadd.f32 %v1558_v57, %v906_v56 }
 0x1c4   : > { %v1653_v8 = vadd.f32 %v2115_v59, %v3133_v42 }
 0x1c5   : > { %v1652_v15 = vadd.f32 %v2116_v1, %v3133_v42 }
 0x1c6   : > { %v1669_v31 = vmax.f32 %v1653_v8, 0.0 }
 0x1c7   : > { %v1668_v18 = vmax.f32 %v1652_v15, 0.0 }
 0x1c8   : > { %1685 = vst.msk [vmem:[%s3139_s29 + $0x18] sm:$0xff] %vm482_vm4, %v1669_v31 }
 0x1c9   : > { %1684 = vst.msk [vmem:[%s3139_s29 + $0x10] sm:$0xff] %vm482_vm4, %v1668_v18 }
 0x1d1   : > { %v2077_v26 = vpop.f32.mrb[4].mxu0 }
 0x1d2   : > { %v2117_v33 = vadd.f32 %v2077_v26, %v2021_v23  ;;  %v1568_v10 = vpop.f32.mrb[5].mxu0 }
 0x1d3   : > { %v2118_v32 = vadd.f32 %v1568_v10, %v916_v58 }
 0x1d4   : > { %v1655_v38 = vadd.f32 %v2117_v33, %v3133_v42 }
 0x1d5   : > { %v1654_v12 = vadd.f32 %v2118_v32, %v3133_v42 }
 0x1d6   : > { %v1671_v21 = vmax.f32 %v1655_v38, 0.0 }
 0x1d7   : > { %v1670_v44 = vmax.f32 %v1654_v12, 0.0 }
 0x1d8   : > { %1687 = vst.msk [vmem:[%s3139_s29 + $0x28] sm:$0xff] %vm482_vm4, %v1671_v21 }
 0x1d9   : > { %1686 = vst.msk [vmem:[%s3139_s29 + $0x20] sm:$0xff] %vm482_vm4, %v1670_v44 }
 0x1e1   : > { %v2080_v28 = vpop.f32.mrb[6].mxu0 }
 0x1e2   : > { %v2119_v34 = vadd.f32 %v2080_v28, %v2024_v60  ;;  %v1578_v63 = vpop.f32.mrb[7].mxu0 }
 0x1e3   : > { %v2120_v20 = vadd.f32 %v1578_v63, %v926_v52 }
 0x1e4   : > { %v1657_v54 = vadd.f32 %v2119_v34, %v3133_v42 }
 0x1e5   : > { %v1656_v62 = vadd.f32 %v2120_v20, %v3133_v42 }
 0x1e6   : > { %v1673_v40 = vmax.f32 %v1657_v54, 0.0 }
 0x1e7   : > { %v1672_v45 = vmax.f32 %v1656_v62, 0.0 }
 0x1e8   : > { %1689 = vst.msk [vmem:[%s3139_s29 + $0x38] sm:$0xff] %vm482_vm4, %v1673_v40 }
 0x1e9   : > { %1688 = vst.msk [vmem:[%s3139_s29 + $0x30] sm:$0xff] %vm482_vm4, %v1672_v45 }
 0x1f1   : > { %v2055_v49 = vpop.f32.mrb[8].mxu1  ;;  %v2083_v4 = vpop.f32.mrb[8].mxu0 }
 0x1f2   : > { %v2121_v25 = vadd.f32 %v2083_v4, %v2055_v49  ;;  %v1132_v46 = vpop.f32.mrb[9].mxu1  ;;  %v1588_v48 = vpop.f32.mrb[9].mxu0 }
 0x1f3   : > { %v2122_v43 = vadd.f32 %v1588_v48, %v1132_v46 }
 0x1f4   : > { %v1659_v22 = vadd.f32 %v2121_v25, %v3133_v42 }
 0x1f5   : > { %v1658_v51 = vadd.f32 %v2122_v43, %v3133_v42 }
 0x1f6   : > { %v1675_v16 = vmax.f32 %v1659_v22, 0.0 }
 0x1f7   : > { %v1674_v13 = vmax.f32 %v1658_v51, 0.0 }
 0x1f8   : > { %1691 = vst.msk [vmem:[%s3139_s29 + $0x48] sm:$0xff] %vm482_vm4, %v1675_v16 }
 0x1f9   : > { %1690 = vst.msk [vmem:[%s3139_s29 + $0x40] sm:$0xff] %vm482_vm4, %v1674_v13 }
 0x201   : > { %v2058_v50 = vpop.f32.mrb[10].mxu1  ;;  %v2086_v3 = vpop.f32.mrb[10].mxu0 }
 0x202   : > { %v2123_v39 = vadd.f32 %v2086_v3, %v2058_v50  ;;  %v1142_v9 = vpop.f32.mrb[11].mxu1  ;;  %v1598_v29 = vpop.f32.mrb[11].mxu0 }
 0x203   : > { %v2124_v30 = vadd.f32 %v1598_v29, %v1142_v9 }
 0x204   : > { %v1661_v11 = vadd.f32 %v2123_v39, %v3133_v42 }
 0x205   : > { %v1660_v47 = vadd.f32 %v2124_v30, %v3133_v42 }
 0x206   : > { %v1677_v61 = vmax.f32 %v1661_v11, 0.0 }
 0x207   : > { %v1676_v0 = vmax.f32 %v1660_v47, 0.0 }
 0x208   : > { %1693 = vst.msk [vmem:[%s3139_s29 + $0x58] sm:$0xff] %vm482_vm4, %v1677_v61 }
 0x209   : > { %1692 = vst.msk [vmem:[%s3139_s29 + $0x50] sm:$0xff] %vm482_vm4, %v1676_v0 }
 0x211   : > { %v2061_v53 = vpop.f32.mrb[12].mxu1  ;;  %v2089_v19 = vpop.f32.mrb[12].mxu0 }
 0x212   : > { %v2125_v27 = vadd.f32 %v2089_v19, %v2061_v53  ;;  %v1152_v35 = vpop.f32.mrb[13].mxu1  ;;  %v1608_v36 = vpop.f32.mrb[13].mxu0 }
 0x213   : > { %v2126_v7 = vadd.f32 %v1608_v36, %v1152_v35 }
 0x214   : > { %v1663_v56 = vadd.f32 %v2125_v27, %v3133_v42 }
 0x215   : > { %v1662_v23 = vadd.f32 %v2126_v7, %v3133_v42 }
 0x216   : > { %v1679_v58 = vmax.f32 %v1663_v56, 0.0 }
 0x217   : > { %v1678_v60 = vmax.f32 %v1662_v23, 0.0 }
 0x218   : > { %1695 = vst.msk [vmem:[%s3139_s29 + $0x68] sm:$0xff] %vm482_vm4, %v1679_v58 }
 0x219   : > { %1694 = vst.msk [vmem:[%s3139_s29 + $0x60] sm:$0xff] %vm482_vm4, %v1678_v60 }
 0x221   : > { %v2064_v52 = vpop.f32.mrb[14].mxu1  ;;  %v2092_v14 = vpop.f32.mrb[14].mxu0 }
 0x222   : > { %v2127_v37 = vadd.f32 %v2092_v14, %v2064_v52  ;;  %v1162_v2 = vpop.f32.mrb[15].mxu1  ;;  %v1618_v6 = vpop.f32.mrb[15].mxu0 }
 0x223   : > { %v2128_v5 = vadd.f32 %v1618_v6, %v1162_v2 }
 0x224   : > { %v1665_v24 = vadd.f32 %v2127_v37, %v3133_v42 }
 0x225   : > { %v1664_v55 = vadd.f32 %v2128_v5, %v3133_v42 }
 0x226   : > { %v1681_v17 = vmax.f32 %v1665_v24, 0.0 }
 0x227   : > { %v1680_v41 = vmax.f32 %v1664_v55, 0.0 }
 0x228   : > { %1697 = vst.msk [vmem:[%s3139_s29 + $0x78] sm:$0xff] %vm482_vm4, %v1681_v17 }
 0x229   : > { %1696 = vst.msk [vmem:[%s3139_s29 + $0x70] sm:$0xff] %vm482_vm4, %v1680_v41 }
 0x22a PF: > { %s13_s16 = sadd.s32 1, %s2228_s16   ;;  %s3259_s12 = smov %s2220_s14 }
 0x22b   : > { %p10_p8 = scmp.ge.s32.totalorder %s13_s16, 6   ;;  %s3260_s13 = smov %s2224_s15 }
 0x22c   : > { %s3261_s14 = smov %s3264_s17  ;;  %s3262_s15 = smov %s3268_s18 }
 0x22d   :  { %12 = sbr.rel (!%p10_p8) target bundleno = 3 (0x3), region = 72 }

</bundles_post_ra>
